<compile_context>
chip_gen: v5e
topology: v5e:2x2
jax: 0.10.0
libtpu: 0.0.40
codegen_flags: <defaults>
</compile_context>

<pallas_src>
import functools

import jax
import jax.numpy as jnp
from jax.experimental import pallas as pl
from jax.experimental.pallas import tpu as pltpu

_LANES = 128


def _nlpcc_pcc_kernel(x_ref, y_ref, pcc_ref, *, total_rows, inv_hw):
    """Per-row PCC for one tile of (rows, HW) spatial maps.

    x_ref, y_ref : (rows, HW) VMEM tiles (any float dtype; computed in f32)
    pcc_ref      : (rows, 128) f32 output tile; per-row PCC broadcast across lanes
    """
    rows = x_ref.shape[0]
    x = x_ref[...].astype(jnp.float32)
    y = y_ref[...].astype(jnp.float32)

    # Raw moments along the spatial (lane) axis — single pass over the tile.
    sum_x = jnp.sum(x, axis=1, keepdims=True)
    sum_y = jnp.sum(y, axis=1, keepdims=True)
    sum_xy = jnp.sum(x * y, axis=1, keepdims=True)
    sum_x2 = jnp.sum(x * x, axis=1, keepdims=True)
    sum_y2 = jnp.sum(y * y, axis=1, keepdims=True)

    inv = jnp.float32(inv_hw)
    cov_xy = sum_xy - sum_x * sum_y * inv
    var_x = sum_x2 - sum_x * sum_x * inv
    var_y = sum_y2 - sum_y * sum_y * inv

    # rsqrt goes to the (otherwise idle) EUP slot; avoids sqrt+sqrt+divide.
    pcc = cov_xy * jax.lax.rsqrt(var_x * var_y)  # (rows, 1)

    # Mask rows past the true N*C (partial last tile reads unspecified padding).
    row0 = pl.program_id(0) * rows
    ridx = row0 + jax.lax.broadcasted_iota(jnp.int32, (rows, 1), 0)
    pcc = jnp.where(ridx < total_rows, pcc, 0.0)

    # Lane-dense store (full 128-wide vst, no masked partial stores).
    pcc_ref[...] = jnp.broadcast_to(pcc, pcc_ref.shape)


def nlpcc_loss(X, Y, *, rows_per_tile=None, target_tile_bytes=2 * 1024 * 1024):
    """X, Y: (N, C, H, W) arrays (NCHW, same as the PyTorch module)."""
    assert X.shape == Y.shape
    N, C, H, W = X.shape
    NC, HW = N * C, H * W

    # Keep HBM traffic at the input dtype (e.g. bf16 stays bf16); cast in-kernel.
    x2d = X.reshape(NC, HW)
    y2d = Y.reshape(NC, HW)

    itemsize = jnp.dtype(x2d.dtype).itemsize
    sublane = max(8, 32 // itemsize)  # 8 for f32, 16 for bf16 (sublane packing)

    if rows_per_tile is None:
        # Size the tile so each input streams ~target_tile_bytes per grid step.
        r = (target_tile_bytes // max(1, HW * itemsize)) // sublane * sublane
        rows_per_tile = max(sublane, r)
    if rows_per_tile >= NC:
        rows_per_tile = NC  # single block equal to full array dim (any NC ok)
    else:
        rows_per_tile = max(sublane, (rows_per_tile // sublane) * sublane)

    grid = (pl.cdiv(NC, rows_per_tile),)

    kernel = functools.partial(
        _nlpcc_pcc_kernel, total_rows=NC, inv_hw=1.0 / float(HW)
    )

    pcc_rows = pl.pallas_call(
        kernel,
        out_shape=jax.ShapeDtypeStruct((NC, _LANES), jnp.float32),
        grid_spec=pltpu.PrefetchScalarGridSpec(
            num_scalar_prefetch=0,
            grid=grid,
            in_specs=[
                pl.BlockSpec((rows_per_tile, HW), lambda i: (i, 0)),
                pl.BlockSpec((rows_per_tile, HW), lambda i: (i, 0)),
            ],
            out_specs=pl.BlockSpec((rows_per_tile, _LANES), lambda i: (i, 0)),
        ),
        compiler_params=pltpu.CompilerParams(
            # No carried state -> fully parallel grid (2-TC sharding on v7x).
            dimension_semantics=("parallel",),
            vmem_limit_bytes=32 * 1024 * 1024,
        ),
    )(x2d, y2d)

    # Tiny final reduction in plain JAX: loss = 1 - mean over all (n, c) of PCC.
    pcc = pcc_rows[:, 0]
    loss = 1.0 - jnp.sum(pcc) / jnp.float32(NC)
    return loss.astype(X.dtype)


def _nlpcc_ref(X, Y):
    """Pure-JAX reference mirroring the PyTorch forward exactly."""
    Xc = X - jnp.mean(X, axis=(2, 3), keepdims=True)
    Yc = Y - jnp.mean(Y, axis=(2, 3), keepdims=True)
    cov_xy = jnp.sum(Xc * Yc, axis=(2, 3))
    cov_x = jnp.sqrt(jnp.sum(Xc ** 2, axis=(2, 3)))
    cov_y = jnp.sqrt(jnp.sum(Yc ** 2, axis=(2, 3)))
    pcc = cov_xy / (cov_x * cov_y)
    return jnp.mean(1.0 - jnp.mean(pcc, axis=1), axis=0)


if __name__ == "__main__":
    # NLPCC has no learnable parameters; only inputs are needed.
    key = jax.random.PRNGKey(0)
    kx, ky = jax.random.split(key)

    # Case 1: default tiling (single full block).
    N, C, H, W = 2, 4, 16, 16
    X = jax.random.normal(kx, (N, C, H, W), dtype=jnp.float32)
    Y = jax.random.normal(ky, (N, C, H, W), dtype=jnp.float32)
    loss = nlpcc_loss(X, Y)
    jax.block_until_ready(loss)
    ref = _nlpcc_ref(X, Y)
    assert jnp.allclose(loss, ref, atol=1e-5, rtol=1e-5), (loss, ref)

    # Case 2: NC not a multiple of the row tile -> exercises the partial-tile
    # (pl.cdiv + mask) path with a multi-step parallel grid.
    N2, C2 = 3, 4
    X2 = jax.random.normal(kx, (N2, C2, H, W), dtype=jnp.float32)
    Y2 = jax.random.normal(ky, (N2, C2, H, W), dtype=jnp.float32)
    loss2 = nlpcc_loss(X2, Y2, rows_per_tile=8)
    jax.block_until_ready(loss2)
    ref2 = _nlpcc_ref(X2, Y2)
    assert jnp.allclose(loss2, ref2, atol=1e-5, rtol=1e-5), (loss2, ref2)

    print("KERNEL_OK")
</pallas_src>

<mosaic_0001>
module attributes {stable_mosaic.version = 11 : i64} {
  func.func @_nlpcc_pcc_kernel(%arg0: i32, %arg1: memref<8x256xf32, #tpu.memory_space<vmem>>, %arg2: memref<8x256xf32, #tpu.memory_space<vmem>>, %arg3: memref<8x128xf32, #tpu.memory_space<vmem>>) attributes {dimension_semantics = [#tpu.dimension_semantics<parallel>], iteration_bounds = array<i64: 1>, scalar_prefetch = 0 : i64, scratch_operands = 0 : i64, tpu.core_type = #tpu.core_type<tc>, window_params = [{transform_indices = @transform_0, window_bounds = array<i64: 8, 256>}, {transform_indices = @transform_1, window_bounds = array<i64: 8, 256>}, {transform_indices = @transform_2, window_bounds = array<i64: 8, 128>}]} {
    %c0 = arith.constant 0 : index
    %c0_0 = arith.constant 0 : index
    %0 = vector.load %arg1[%c0, %c0_0] : memref<8x256xf32, #tpu.memory_space<vmem>>, vector<8x256xf32>
    %c0_1 = arith.constant 0 : index
    %c0_2 = arith.constant 0 : index
    %1 = vector.load %arg2[%c0_1, %c0_2] : memref<8x256xf32, #tpu.memory_space<vmem>>, vector<8x256xf32>
    %cst = arith.constant dense<0.000000e+00> : vector<8xf32>
    %2 = vector.multi_reduction <add>, %0, %cst [1] : vector<8x256xf32> to vector<8xf32>
    %3 = vector.shape_cast %2 : vector<8xf32> to vector<8x1xf32>
    %cst_3 = arith.constant dense<0.000000e+00> : vector<8xf32>
    %4 = vector.multi_reduction <add>, %1, %cst_3 [1] : vector<8x256xf32> to vector<8xf32>
    %5 = vector.shape_cast %4 : vector<8xf32> to vector<8x1xf32>
    %6 = arith.mulf %0, %1 : vector<8x256xf32>
    %cst_4 = arith.constant dense<0.000000e+00> : vector<8xf32>
    %7 = vector.multi_reduction <add>, %6, %cst_4 [1] : vector<8x256xf32> to vector<8xf32>
    %8 = vector.shape_cast %7 : vector<8xf32> to vector<8x1xf32>
    %9 = arith.mulf %0, %0 : vector<8x256xf32>
    %cst_5 = arith.constant dense<0.000000e+00> : vector<8xf32>
    %10 = vector.multi_reduction <add>, %9, %cst_5 [1] : vector<8x256xf32> to vector<8xf32>
    %11 = vector.shape_cast %10 : vector<8xf32> to vector<8x1xf32>
    %12 = arith.mulf %1, %1 : vector<8x256xf32>
    %cst_6 = arith.constant dense<0.000000e+00> : vector<8xf32>
    %13 = vector.multi_reduction <add>, %12, %cst_6 [1] : vector<8x256xf32> to vector<8xf32>
    %14 = vector.shape_cast %13 : vector<8xf32> to vector<8x1xf32>
    %15 = arith.mulf %3, %5 : vector<8x1xf32>
    %cst_7 = arith.constant 3.906250e-03 : f32
    %16 = vector.broadcast %cst_7 : f32 to vector<8x1xf32>
    %17 = arith.mulf %15, %16 : vector<8x1xf32>
    %18 = arith.subf %8, %17 : vector<8x1xf32>
    %19 = arith.mulf %3, %3 : vector<8x1xf32>
    %cst_8 = arith.constant 3.906250e-03 : f32
    %20 = vector.broadcast %cst_8 : f32 to vector<8x1xf32>
    %21 = arith.mulf %19, %20 : vector<8x1xf32>
    %22 = arith.subf %11, %21 : vector<8x1xf32>
    %23 = arith.mulf %5, %5 : vector<8x1xf32>
    %cst_9 = arith.constant 3.906250e-03 : f32
    %24 = vector.broadcast %cst_9 : f32 to vector<8x1xf32>
    %25 = arith.mulf %23, %24 : vector<8x1xf32>
    %26 = arith.subf %14, %25 : vector<8x1xf32>
    %27 = arith.mulf %22, %26 : vector<8x1xf32>
    %28 = math.rsqrt %27 : vector<8x1xf32>
    %29 = arith.mulf %18, %28 : vector<8x1xf32>
    %c8_i32 = arith.constant 8 : i32
    %30 = arith.muli %arg0, %c8_i32 : i32
    %31 = tpu.iota {dimensions = array<i32: 0>} : vector<8x1xi32>
    %32 = vector.broadcast %30 : i32 to vector<8x1xi32>
    %33 = arith.addi %32, %31 : vector<8x1xi32>
    %c8_i32_10 = arith.constant 8 : i32
    %34 = vector.broadcast %c8_i32_10 : i32 to vector<8x1xi32>
    %35 = arith.cmpi slt, %33, %34 : vector<8x1xi32>
    %cst_11 = arith.constant 0.000000e+00 : f32
    %36 = vector.broadcast %cst_11 : f32 to vector<8x1xf32>
    %37 = arith.select %35, %29, %36 : vector<8x1xi1>, vector<8x1xf32>
    %38 = vector.shape_cast %37 : vector<8x1xf32> to vector<8x1xf32>
    %39 = vector.broadcast %38 : vector<8x1xf32> to vector<8x128xf32>
    %c0_12 = arith.constant 0 : index
    %c0_13 = arith.constant 0 : index
    %40 = vector.load %arg3[%c0_12, %c0_13] : memref<8x128xf32, #tpu.memory_space<vmem>>, vector<8x128xf32>
    tpu.vector_store %arg3[%c0_12, %c0_13], %39 {strides = array<i32>} : memref<8x128xf32, #tpu.memory_space<vmem>>, vector<8x128xf32>,
    return
  }
  func.func @transform_0(%arg0: i32) -> (i32, i32) {
    %c0_i32 = arith.constant 0 : i32
    %c0_i32_0 = arith.constant 0 : i32
    return %arg0, %c0_i32 : i32, i32
  }
  func.func @transform_1(%arg0: i32) -> (i32, i32) {
    %c0_i32 = arith.constant 0 : i32
    %c0_i32_0 = arith.constant 0 : i32
    return %arg0, %c0_i32 : i32, i32
  }
  func.func @transform_2(%arg0: i32) -> (i32, i32) {
    %c0_i32 = arith.constant 0 : i32
    %c0_i32_0 = arith.constant 0 : i32
    return %arg0, %c0_i32 : i32, i32
  }
}

</mosaic_0001>

<bundles_post_ra>
// kernel: tpu_custom_call.1
= control target key start
LH: loop header
LB: loop body
LE: loop exit
PB: predicated region body
PF: predicated region fallthrough
CT: control target
= control target key end

     0   :  { %7 = vsyncpa [#allocation3], 0  ;;  %s222_s0 = inlined_call_operand.hbm [shape: f32[8,256], index: 0, kind: input, shape index: {}]   ;;  %s223_s1 = inlined_call_operand.hbm [shape: f32[8,256], index: 1, kind: input, shape index: {}]   ;;  %s224_s2 = inlined_call_operand.hbm [shape: f32[8,128], index: 2, kind: output, shape index: {}]  }
   0x1   :  { %8 = vsyncpa [#allocation6], 0 }
   0x2   :  { %9 = vsyncpa [#allocation4], 0  ;;  %s15_s11 = sshll.u32 %s222_s0, 4  ;;  %s195_s12 = smov [#allocation2]   ;;  %s16_s11 = int_to_ptr.hbm [resolvable:$true] %s15_s11 }
   0x3   :  { %s17_s13 = sshll.u32 %s195_s12, 4  ;;  %s26_s16 = sshll.u32 %s223_s1, 4  ;;  %s18_s13 = int_to_ptr.vmem [resolvable:$true] %s17_s13  ;;  %s27_s16 = int_to_ptr.hbm [resolvable:$true] %s26_s16 }
   0x4   :  { %20 = dma.hbm_to_vmem [thread:$0]  %s16_s11, 256, %s18_s13, [#allocation3]  }
   0x5   :  { %s196_s17 = smov [#allocation5]  }
   0x6   :  { %s28_s18 = sshll.u32 %s196_s17, 4  ;;  %s29_s18 = int_to_ptr.vmem [resolvable:$true] %s28_s18 }
   0x7   :  { %31 = dma.hbm_to_vmem [thread:$0]  %s27_s16, 256, %s29_s18, [#allocation6]  }
   0x8   :  { %189 = dma.done.wait [#allocation3], 256  }
   0x9   :  { %190 = vsyncadd [#allocation3], 4294967040 }
   0xa   :  { %191 = dma.done.wait [#allocation6], 256  }
   0xb   :  { %192 = vsyncadd [#allocation6], 4294967040  ;;  %v40_v0 = vld [vmem:[#allocation2] sm:$0xff]  ;;  %v41_v1 = vld [vmem:[#allocation2 + $0x8] sm:$0xff]  ;;  %s197_s0 = smov [#allocation7]   ;;  %s101_s21 = sshll.u32 %s224_s2, 4  ;;  %s102_s21 = int_to_ptr.hbm [resolvable:$true] %s101_s21 }
   0xc   :  { %v44_v2 = vadd.f32 %v41_v1, %v40_v0  ;;  %v55_v3 = vmul.f32 %v40_v0, %v40_v0  ;;  %v56_v4 = vmul.f32 %v41_v1, %v41_v1  ;;  %v42_v5 = vld [vmem:[#allocation5] sm:$0xff]  ;;  %v43_v6 = vld [vmem:[#allocation5 + $0x8] sm:$0xff]  ;;  %s99_s1 = sshll.u32 %s197_s0, 4  ;;  %s100_s1 = int_to_ptr.vmem [resolvable:$true] %s99_s1 }
   0xd   :  { %v50_v7 = vmul.f32 %v42_v5, %v40_v0  ;;  %v51_v8 = vmul.f32 %v43_v6, %v41_v1  ;;  %v60_v11 = vmul.f32 %v42_v5, %v42_v5  ;;  %v61_v12 = vmul.f32 %v43_v6, %v43_v6 }
   0xe   :  { %45 = vadd.xlane.f32.xlu0 %v44_v2  ;;  %v57_v9 = vadd.f32 %v56_v4, %v55_v3  ;;  %v47_v13 = vadd.f32 %v43_v6, %v42_v5 }
   0xf   :  { %v52_v10 = vadd.f32 %v51_v8, %v50_v7  ;;  %v62_v14 = vadd.f32 %v61_v12, %v60_v11 }
  0x10   :  { %58 = vadd.xlane.f32.xlu1 %v57_v9 }
  0x11   :  { %53 = vadd.xlane.f32.xlu2 %v52_v10 }
  0x16   :  { %48 = vadd.xlane.f32.xlu0 %v47_v13 }
  0x18   :  { %63 = vadd.xlane.f32.xlu1 %v62_v14 }
  0x81   :  { %v46_v15 = vpop.xlane.xlu0 %45 }
  0x82   :  { %v68_v17 = vmul.f32 %v46_v15, %v46_v15 }
  0x83   :  { %v59_v16 = vpop.xlane.xlu1 %58 }
  0x84   :  { %v69_v19 = vmul.f32 0.00390625, %v68_v17  ;;  %v54_v32 = vpop.xlane.xlu2 %53 }
  0x86   :  { %v70_v23 = vsub.f32 %v59_v16, %v69_v19 }
  0x89   :  { %v49_v18 = vpop.xlane.xlu0 %48 }
  0x8a   :  { %v71_v20 = vmul.f32 %v49_v18, %v49_v18  ;;  %v65_v28 = vmul.f32 %v49_v18, %v46_v15 }
  0x8b   :  { %v64_v21 = vpop.xlane.xlu1 %63 }
  0x8c   :  { %v72_v22 = vmul.f32 0.00390625, %v71_v20  ;;  %v66_v31 = vmul.f32 0.00390625, %v65_v28 }
  0x8e   :  { %v73_v24 = vsub.f32 %v64_v21, %v72_v22  ;;  %v67_v35 = vsub.f32 %v54_v32, %v66_v31 }
  0x90   :  { %v74_v25 = vmul.f32 %v73_v24, %v70_v23 }
  0x92   :  { %115 = vrsqrt.f32 %v74_v25  ;;  %vm81_vm1 = vweird.f32 %v74_v25 }
  0x98   :  { %v116_v26 = vpop.eup %115 }
  0x99   :  { %v76_v27 = vmul.f32 %v116_v26, %v74_v25  ;;  %vm82_vm0 = vweird.f32 %v116_v26 }
  0x9a   :  { %vm83_vm2 = vmor %vm81_vm1, %vm82_vm0 }
  0x9b   :  { %v77_v29 = vmul.f32 %v116_v26, %v76_v27 }
  0x9d   :  { %v78_v30 = vmul.f32 0.5, %v77_v29 }
  0x9f   :  { %v79_v33 = vsub.f32 1.5, %v78_v30 }
  0xa1   :  { %v80_v34 = vmul.f32 %v116_v26, %v79_v33 }
  0xa3   :  { %v84_v36 = vsel %vm83_vm2, %v116_v26, %v80_v34 }
  0xa4   :  { %v85_v37 = vmul.f32 %v84_v36, %v67_v35 }
  0xa6   :  { %93 = vst [vmem:[#allocation7] sm:$0xff] %v85_v37 }
  0xa7   :  { %104 = dma.vmem_to_hbm [thread:$0]  %s100_s1, 128, %s102_s21, [#allocation4]  }
  0xa8   :  { %193 = dma.done.wait [#allocation4], 128  }
  0xa9   :  { %194 = vsyncadd [#allocation4], 4294967168 }
  0xaa   :  { %109 = vsyncpa [#allocation3], 1 }
  0xab   :  { %110 = vsyncpa [#allocation6], 1 }
  0xac   :  { %111 = vsyncpa [#allocation4], 1 }

</bundles_post_ra>
